<compile_context>
chip_gen: v5e
topology: v5e:2x2
jax: 0.10.0
libtpu: 0.0.40
codegen_flags: <defaults>
</compile_context>

<pallas_src>
import functools

import numpy as np
import jax
import jax.numpy as jnp
from jax.experimental import pallas as pl
from jax.experimental.pallas import tpu as pltpu


# ----------------------------------------------------------------------------
# Pallas kernel: one plane-block of the fused crop+resize.
#   x_ref  : (B, H, W)  B image planes, natural layout (bf16 or f32)
#   wy_ref : (S, H)     row interp, crop offset embedded (zeros outside crop)
#   wxt_ref: (W, S)     column interp, pre-transposed
#   o_ref  : (B, S, S)  natural-layout output (f32)
# Per plane: (S,H) @ (H,W) @ (W,S). MXU row-utilization is low when S is tiny,
# but the kernel is HBM/DMA bound at this arithmetic intensity (accepted per
# review; do not add grid steps to "use the MXU better").
# ----------------------------------------------------------------------------
def _resize_kernel(x_ref, wy_ref, wxt_ref, o_ref):
    wy = wy_ref[...]
    wxt = wxt_ref[...]
    nb = x_ref.shape[0]

    def one_plane(b):
        t = jnp.dot(wy, x_ref[b], preferred_element_type=jnp.float32)   # (S, W)
        t = t.astype(wxt.dtype)                                         # keep MXU native
        o = jnp.dot(t, wxt, preferred_element_type=jnp.float32)         # (S, S)
        o_ref[b] = o.astype(o_ref.dtype)

    if nb <= 32:                       # static unroll: LLO sees the whole schedule
        for b in range(nb):
            one_plane(b)
    else:                              # very large plane blocks: bound code size
        def body(b, carry):
            one_plane(b)
            return carry
        jax.lax.fori_loop(0, nb, body, 0)


# ----------------------------------------------------------------------------
# Generation-aware tiling
# ----------------------------------------------------------------------------
@functools.lru_cache(maxsize=None)
def _device_info():
    """(num_tensorcores, vmem_capacity_bytes) of the default device."""
    num_cores = 1
    try:
        kind = (jax.devices()[0].device_kind or "").lower()
        if any(tag in kind for tag in ("v4", "v5p", "7x", "tpu7")):
            num_cores = 2          # megacore (v4/v5p) / dual-TC (v7x)
    except Exception:
        pass
    try:
        vmem_cap = int(pltpu.get_tpu_info().vmem_capacity_bytes)
    except Exception:
        vmem_cap = 64 << 20        # conservative fallback (v7x per-core size)
    return num_cores, vmem_cap


def _step_vmem_bytes(b, h, w, s, in_bytes):
    # double-buffered (B,H,W) input + (B,S,S) f32 output tiles, plus the two
    # (grid-invariant) weight tiles which the pipeline still double-buffers.
    return (2 * b * h * w * in_bytes
            + 2 * b * s * s * 4
            + 2 * (s * h + w * s) * in_bytes)


def _choose_plane_block(nc, h, w, s, in_bytes):
    """Planes per grid step: the largest divisor of NC (-> zero dead padded
    planes) that fits the VMEM budget. On multi-TC chips prefer G = NC/B that
    splits evenly across cores; on single-TC chips prefer G = 1."""
    num_cores, vmem_cap = _device_info()
    budget = max(16 << 20, min(vmem_cap // 2, 48 << 20))
    best_any = None
    for b in range(nc, 0, -1):
        if nc % b:
            continue
        if b > 1 and _step_vmem_bytes(b, h, w, s, in_bytes) > budget:
            continue
        if best_any is None:
            best_any = b
        g = nc // b
        if num_cores <= 1 or g % num_cores == 0:
            return b
    return best_any if best_any is not None else 1


@functools.lru_cache(maxsize=None)
def _make_resize_fn(N, C, H, W, S, B, G, cdtype):
    NC = N * C
    _, vmem_cap = _device_info()
    step_bytes = _step_vmem_bytes(B, H, W, S, cdtype.itemsize)
    vmem_limit = int(min(vmem_cap, max(32 << 20, step_bytes + (4 << 20))))
    cost = pl.CostEstimate(
        flops=int(NC * (2 * S * H * W + 2 * S * S * W)),
        transcendentals=0,
        bytes_accessed=int((NC * H * W + S * H + W * S) * cdtype.itemsize
                           + NC * S * S * 4),
    )

    def fn(img, wy, wxt):
        # Contiguous reshape only (no transpose) -> no XLA-side repack of the
        # image; the astype is a no-op when the caller already supplies bf16.
        x = img.astype(cdtype).reshape(G, B, H, W)
        out = pl.pallas_call(
            _resize_kernel,
            out_shape=jax.ShapeDtypeStruct((G, B, S, S), jnp.float32),
            grid=(G,),
            in_specs=[
                pl.BlockSpec((pl.Squeezed(), B, H, W), lambda g: (g, 0, 0, 0)),
                # Grid-invariant weights: constant block index => the pipeline
                # does not re-DMA them across grid steps.
                pl.BlockSpec((S, H), lambda g: (0, 0)),
                pl.BlockSpec((W, S), lambda g: (0, 0)),
            ],
            out_specs=pl.BlockSpec((pl.Squeezed(), B, S, S),
                                   lambda g: (g, 0, 0, 0)),
            compiler_params=pltpu.CompilerParams(
                dimension_semantics=("parallel",),
                vmem_limit_bytes=vmem_limit),
            cost_estimate=cost,
        )(x, wy, wxt)
        return out.reshape(N, C, S, S)   # contiguous: pure metadata reshape

    return jax.jit(fn)


def corner_resize_pallas(img, wy_np, wx_np, compute_dtype=jnp.bfloat16):
    """img: (N, C, H, W) float; wy_np: (S, H), wx_np: (S, W) full-width bilinear
    interp matrices with the crop offset embedded (zeros outside the crop).
    Returns (N, C, S, S) f32. HBM-resident operands are cast to `compute_dtype`
    (bf16 default) with f32 accumulation; pass a bf16 image to skip the cast."""
    img = jnp.asarray(img)
    N, C, H, W = img.shape
    S = int(wy_np.shape[0])
    NC = N * C
    cdtype = np.dtype(compute_dtype)
    B = _choose_plane_block(NC, H, W, S, cdtype.itemsize)
    G = NC // B
    fn = _make_resize_fn(N, C, H, W, S, B, G, cdtype)
    wy = jnp.asarray(wy_np, dtype=cdtype)
    wxt = jnp.asarray(np.ascontiguousarray(wx_np.T), dtype=cdtype)
    return fn(img, wy, wxt)


# ----------------------------------------------------------------------------
# Bilinear interpolation matrix (align_corners=False, PyTorch semantics), built
# over the FULL axis length with the crop offset embedded (zeros outside crop).
# ----------------------------------------------------------------------------
def _bilinear_matrix(out_size, crop_size, full_size, offset):
    d = np.arange(out_size, dtype=np.float64)
    src = (d + 0.5) * (crop_size / out_size) - 0.5
    src = np.maximum(src, 0.0)                  # PyTorch clamps the low end only
    x0 = np.floor(src).astype(np.int64)
    x0 = np.minimum(x0, crop_size - 1)
    x1 = np.minimum(x0 + 1, crop_size - 1)
    frac = src - x0
    Wm = np.zeros((out_size, full_size), dtype=np.float32)
    rows = np.arange(out_size)
    Wm[rows, offset + x0] += (1.0 - frac).astype(np.float32)
    Wm[rows, offset + x1] += frac.astype(np.float32)
    return Wm


# ----------------------------------------------------------------------------
# CornerCropping module (stateful corner selection, deterministic RNG)
# ----------------------------------------------------------------------------
class CornerCropping:
    def __init__(self, size, scale=(0.4, 0.85), ratio=(3 / 4, 4 / 3), seed=0):
        self.size = (size, size)
        self.scale = scale
        self.ratio = ratio
        self.corner_map = {0: 3, 1: 2, 3: 0, 2: 1}
        self.selected_corner = None
        self._rng = np.random.RandomState(seed)  # deterministic stand-in for np.random

    @staticmethod
    def _clamp(h, w, H, W):
        return max(1, min(int(h), H)), max(1, min(int(w), W))

    def get_params(self, img_shape):
        H, W = img_shape[-2], img_shape[-1]
        for _ in range(10):
            area = H * W
            target_area = self._rng.uniform(*self.scale) * area
            aspect_ratio = self._rng.uniform(*self.ratio)
            w = int(round(np.sqrt(target_area * aspect_ratio)))
            h = int(round(np.sqrt(target_area / aspect_ratio)))
            if self._rng.random_sample() < 0.5:
                w, h = h, w
            if w <= H and h <= W:               # mirrors the original's axis order
                return self._clamp(h, w, H, W)
        # TODO(synk): original fallback indexes img.shape[0]/[1] (N, C for NCHW);
        # kept verbatim for fidelity but clamped so the crop stays inside the image.
        w = min(img_shape[0], img_shape[1])
        return self._clamp(w, w, H, W)

    def crop_corner(self, img, selected_corner):
        H, W = img.shape[-2], img.shape[-1]
        h, w = self.get_params(img.shape)
        if selected_corner == 0:
            i, j = 0, 0
        elif selected_corner == 1:
            i, j = H - h, 0
        elif selected_corner == 2:
            i, j = 0, W - w
        elif selected_corner == 3:
            i, j = H - h, W - w
        else:
            raise ValueError('Case should not occur!')
        # crop + resize fused into full-width interp matrices -> static kernel shapes
        wy = _bilinear_matrix(self.size[0], h, H, i)
        wx = _bilinear_matrix(self.size[1], w, W, j)
        return corner_resize_pallas(img, wy, wx)

    def crop_opposite_corner(self, img, selected_corner):
        return self.crop_corner(img, self.corner_map[selected_corner])

    def __call__(self, img):
        if self.selected_corner is None:
            self.selected_corner = int(self._rng.randint(0, 4))
            out = self.crop_corner(img, self.selected_corner)
        else:
            out = self.crop_opposite_corner(img, self.selected_corner)
            self.selected_corner = None
        return out


if __name__ == "__main__":
    key = jax.random.PRNGKey(0)
    # small NCHW image batch: batch=2, channels=4, spatial=16
    x = jax.random.normal(key, (2, 4, 16, 16), dtype=jnp.float32)

    module = CornerCropping(size=8, seed=0)

    out1 = module(x)   # first call: random corner crop
    out2 = module(x)   # second call: opposing corner crop
    jax.block_until_ready(out1)
    jax.block_until_ready(out2)

    assert out1.shape == (2, 4, 8, 8) and out2.shape == (2, 4, 8, 8)
    assert out1.dtype == jnp.float32 and out2.dtype == jnp.float32

    # Direct numerical check of the Pallas crop+resize path vs a float64 host
    # reference built from the same bf16-quantized operands the kernel reads.
    wy_t = _bilinear_matrix(8, 12, 16, 2)   # rows [2, 14) -> 8
    wx_t = _bilinear_matrix(8, 10, 16, 4)   # cols [4, 14) -> 8
    got = corner_resize_pallas(x, wy_t, wx_t)
    jax.block_until_ready(got)

    def _q(a):  # bf16-quantize, then promote to f64 (matches kernel operands)
        return np.asarray(jnp.asarray(a, jnp.bfloat16)).astype(np.float64)

    ref = np.einsum('sh,nchw,tw->ncst', _q(wy_t), _q(np.asarray(x)), _q(wx_t))
    err = float(np.max(np.abs(np.asarray(got, dtype=np.float64) - ref)))
    assert err < 5e-2, f"pallas resize mismatch vs reference: max|diff|={err}"

    print("KERNEL_OK")
</pallas_src>

<mosaic_0001>
module attributes {stable_mosaic.version = 11 : i64} {
  func.func @_resize_kernel(%arg0: i32, %arg1: memref<1x8x16x16xbf16, #tpu.memory_space<vmem>>, %arg2: memref<8x16xbf16, #tpu.memory_space<vmem>>, %arg3: memref<16x8xbf16, #tpu.memory_space<vmem>>, %arg4: memref<1x8x8x8xf32, #tpu.memory_space<vmem>>) attributes {dimension_semantics = [#tpu.dimension_semantics<parallel>], iteration_bounds = array<i64: 1>, scalar_prefetch = 0 : i64, scratch_operands = 0 : i64, tpu.core_type = #tpu.core_type<tc>, window_params = [{transform_indices = @transform_0, window_bounds = array<i64: 1, 8, 16, 16>}, {pipeline_mode = #tpu.pipeline_mode<synchronous>, transform_indices = @transform_1, window_bounds = array<i64: 8, 16>}, {pipeline_mode = #tpu.pipeline_mode<synchronous>, transform_indices = @transform_2, window_bounds = array<i64: 16, 8>}, {transform_indices = @transform_3, window_bounds = array<i64: 1, 8, 8, 8>}]} {
    %c0 = arith.constant 0 : index
    %c0_0 = arith.constant 0 : index
    %0 = vector.load %arg2[%c0, %c0_0] : memref<8x16xbf16, #tpu.memory_space<vmem>>, vector<8x16xbf16>
    %c0_1 = arith.constant 0 : index
    %c0_2 = arith.constant 0 : index
    %1 = vector.load %arg3[%c0_1, %c0_2] : memref<16x8xbf16, #tpu.memory_space<vmem>>, vector<16x8xbf16>
    %c0_3 = arith.constant 0 : index
    %c0_4 = arith.constant 0 : index
    %c0_5 = arith.constant 0 : index
    %c0_6 = arith.constant 0 : index
    %2 = vector.load %arg1[%c0_3, %c0_4, %c0_5, %c0_6] : memref<1x8x16x16xbf16, #tpu.memory_space<vmem>>, vector<1x1x16x16xbf16>
    %3 = vector.shape_cast %2 : vector<1x1x16x16xbf16> to vector<16x16xbf16>
    %cst = arith.constant dense<0.000000e+00> : vector<8x16xf32>
    %4 = tpu.matmul %0, %3, %cst {dimension_numbers = #tpu.dot_dimension_numbers<[1], [0], [0], [1], [0, 0, 1, 1], [], []>} : vector<8x16xbf16>, vector<16x16xbf16>, vector<8x16xf32> -> vector<8x16xf32>
    %5 = arith.truncf %4 : vector<8x16xf32> to vector<8x16xbf16>
    %cst_7 = arith.constant dense<0.000000e+00> : vector<8x8xf32>
    %6 = tpu.matmul %5, %1, %cst_7 {dimension_numbers = #tpu.dot_dimension_numbers<[1], [0], [0], [1], [0, 0, 1, 1], [], []>} : vector<8x16xbf16>, vector<16x8xbf16>, vector<8x8xf32> -> vector<8x8xf32>
    %c0_8 = arith.constant 0 : index
    %c0_9 = arith.constant 0 : index
    %c0_10 = arith.constant 0 : index
    %c0_11 = arith.constant 0 : index
    %7 = vector.load %arg4[%c0_8, %c0_9, %c0_10, %c0_11] : memref<1x8x8x8xf32, #tpu.memory_space<vmem>>, vector<1x1x8x8xf32>
    %8 = vector.shape_cast %7 : vector<1x1x8x8xf32> to vector<8x8xf32>
    %9 = vector.shape_cast %6 : vector<8x8xf32> to vector<1x1x8x8xf32>
    tpu.vector_store %arg4[%c0_8, %c0_9, %c0_10, %c0_11], %9 {strides = array<i32>} : memref<1x8x8x8xf32, #tpu.memory_space<vmem>>, vector<1x1x8x8xf32>,
    %c0_12 = arith.constant 0 : index
    %c1 = arith.constant 1 : index
    %c0_13 = arith.constant 0 : index
    %c0_14 = arith.constant 0 : index
    %10 = vector.load %arg1[%c0_12, %c1, %c0_13, %c0_14] : memref<1x8x16x16xbf16, #tpu.memory_space<vmem>>, vector<1x1x16x16xbf16>
    %11 = vector.shape_cast %10 : vector<1x1x16x16xbf16> to vector<16x16xbf16>
    %cst_15 = arith.constant dense<0.000000e+00> : vector<8x16xf32>
    %12 = tpu.matmul %0, %11, %cst_15 {dimension_numbers = #tpu.dot_dimension_numbers<[1], [0], [0], [1], [0, 0, 1, 1], [], []>} : vector<8x16xbf16>, vector<16x16xbf16>, vector<8x16xf32> -> vector<8x16xf32>
    %13 = arith.truncf %12 : vector<8x16xf32> to vector<8x16xbf16>
    %cst_16 = arith.constant dense<0.000000e+00> : vector<8x8xf32>
    %14 = tpu.matmul %13, %1, %cst_16 {dimension_numbers = #tpu.dot_dimension_numbers<[1], [0], [0], [1], [0, 0, 1, 1], [], []>} : vector<8x16xbf16>, vector<16x8xbf16>, vector<8x8xf32> -> vector<8x8xf32>
    %c0_17 = arith.constant 0 : index
    %c1_18 = arith.constant 1 : index
    %c0_19 = arith.constant 0 : index
    %c0_20 = arith.constant 0 : index
    %15 = vector.load %arg4[%c0_17, %c1_18, %c0_19, %c0_20] : memref<1x8x8x8xf32, #tpu.memory_space<vmem>>, vector<1x1x8x8xf32>
    %16 = vector.shape_cast %15 : vector<1x1x8x8xf32> to vector<8x8xf32>
    %17 = vector.shape_cast %14 : vector<8x8xf32> to vector<1x1x8x8xf32>
    tpu.vector_store %arg4[%c0_17, %c1_18, %c0_19, %c0_20], %17 {strides = array<i32>} : memref<1x8x8x8xf32, #tpu.memory_space<vmem>>, vector<1x1x8x8xf32>,
    %c0_21 = arith.constant 0 : index
    %c2 = arith.constant 2 : index
    %c0_22 = arith.constant 0 : index
    %c0_23 = arith.constant 0 : index
    %18 = vector.load %arg1[%c0_21, %c2, %c0_22, %c0_23] : memref<1x8x16x16xbf16, #tpu.memory_space<vmem>>, vector<1x1x16x16xbf16>
    %19 = vector.shape_cast %18 : vector<1x1x16x16xbf16> to vector<16x16xbf16>
    %cst_24 = arith.constant dense<0.000000e+00> : vector<8x16xf32>
    %20 = tpu.matmul %0, %19, %cst_24 {dimension_numbers = #tpu.dot_dimension_numbers<[1], [0], [0], [1], [0, 0, 1, 1], [], []>} : vector<8x16xbf16>, vector<16x16xbf16>, vector<8x16xf32> -> vector<8x16xf32>
    %21 = arith.truncf %20 : vector<8x16xf32> to vector<8x16xbf16>
    %cst_25 = arith.constant dense<0.000000e+00> : vector<8x8xf32>
    %22 = tpu.matmul %21, %1, %cst_25 {dimension_numbers = #tpu.dot_dimension_numbers<[1], [0], [0], [1], [0, 0, 1, 1], [], []>} : vector<8x16xbf16>, vector<16x8xbf16>, vector<8x8xf32> -> vector<8x8xf32>
    %c0_26 = arith.constant 0 : index
    %c2_27 = arith.constant 2 : index
    %c0_28 = arith.constant 0 : index
    %c0_29 = arith.constant 0 : index
    %23 = vector.load %arg4[%c0_26, %c2_27, %c0_28, %c0_29] : memref<1x8x8x8xf32, #tpu.memory_space<vmem>>, vector<1x1x8x8xf32>
    %24 = vector.shape_cast %23 : vector<1x1x8x8xf32> to vector<8x8xf32>
    %25 = vector.shape_cast %22 : vector<8x8xf32> to vector<1x1x8x8xf32>
    tpu.vector_store %arg4[%c0_26, %c2_27, %c0_28, %c0_29], %25 {strides = array<i32>} : memref<1x8x8x8xf32, #tpu.memory_space<vmem>>, vector<1x1x8x8xf32>,
    %c0_30 = arith.constant 0 : index
    %c3 = arith.constant 3 : index
    %c0_31 = arith.constant 0 : index
    %c0_32 = arith.constant 0 : index
    %26 = vector.load %arg1[%c0_30, %c3, %c0_31, %c0_32] : memref<1x8x16x16xbf16, #tpu.memory_space<vmem>>, vector<1x1x16x16xbf16>
    %27 = vector.shape_cast %26 : vector<1x1x16x16xbf16> to vector<16x16xbf16>
    %cst_33 = arith.constant dense<0.000000e+00> : vector<8x16xf32>
    %28 = tpu.matmul %0, %27, %cst_33 {dimension_numbers = #tpu.dot_dimension_numbers<[1], [0], [0], [1], [0, 0, 1, 1], [], []>} : vector<8x16xbf16>, vector<16x16xbf16>, vector<8x16xf32> -> vector<8x16xf32>
    %29 = arith.truncf %28 : vector<8x16xf32> to vector<8x16xbf16>
    %cst_34 = arith.constant dense<0.000000e+00> : vector<8x8xf32>
    %30 = tpu.matmul %29, %1, %cst_34 {dimension_numbers = #tpu.dot_dimension_numbers<[1], [0], [0], [1], [0, 0, 1, 1], [], []>} : vector<8x16xbf16>, vector<16x8xbf16>, vector<8x8xf32> -> vector<8x8xf32>
    %c0_35 = arith.constant 0 : index
    %c3_36 = arith.constant 3 : index
    %c0_37 = arith.constant 0 : index
    %c0_38 = arith.constant 0 : index
    %31 = vector.load %arg4[%c0_35, %c3_36, %c0_37, %c0_38] : memref<1x8x8x8xf32, #tpu.memory_space<vmem>>, vector<1x1x8x8xf32>
    %32 = vector.shape_cast %31 : vector<1x1x8x8xf32> to vector<8x8xf32>
    %33 = vector.shape_cast %30 : vector<8x8xf32> to vector<1x1x8x8xf32>
    tpu.vector_store %arg4[%c0_35, %c3_36, %c0_37, %c0_38], %33 {strides = array<i32>} : memref<1x8x8x8xf32, #tpu.memory_space<vmem>>, vector<1x1x8x8xf32>,
    %c0_39 = arith.constant 0 : index
    %c4 = arith.constant 4 : index
    %c0_40 = arith.constant 0 : index
    %c0_41 = arith.constant 0 : index
    %34 = vector.load %arg1[%c0_39, %c4, %c0_40, %c0_41] : memref<1x8x16x16xbf16, #tpu.memory_space<vmem>>, vector<1x1x16x16xbf16>
    %35 = vector.shape_cast %34 : vector<1x1x16x16xbf16> to vector<16x16xbf16>
    %cst_42 = arith.constant dense<0.000000e+00> : vector<8x16xf32>
    %36 = tpu.matmul %0, %35, %cst_42 {dimension_numbers = #tpu.dot_dimension_numbers<[1], [0], [0], [1], [0, 0, 1, 1], [], []>} : vector<8x16xbf16>, vector<16x16xbf16>, vector<8x16xf32> -> vector<8x16xf32>
    %37 = arith.truncf %36 : vector<8x16xf32> to vector<8x16xbf16>
    %cst_43 = arith.constant dense<0.000000e+00> : vector<8x8xf32>
    %38 = tpu.matmul %37, %1, %cst_43 {dimension_numbers = #tpu.dot_dimension_numbers<[1], [0], [0], [1], [0, 0, 1, 1], [], []>} : vector<8x16xbf16>, vector<16x8xbf16>, vector<8x8xf32> -> vector<8x8xf32>
    %c0_44 = arith.constant 0 : index
    %c4_45 = arith.constant 4 : index
    %c0_46 = arith.constant 0 : index
    %c0_47 = arith.constant 0 : index
    %39 = vector.load %arg4[%c0_44, %c4_45, %c0_46, %c0_47] : memref<1x8x8x8xf32, #tpu.memory_space<vmem>>, vector<1x1x8x8xf32>
    %40 = vector.shape_cast %39 : vector<1x1x8x8xf32> to vector<8x8xf32>
    %41 = vector.shape_cast %38 : vector<8x8xf32> to vector<1x1x8x8xf32>
    tpu.vector_store %arg4[%c0_44, %c4_45, %c0_46, %c0_47], %41 {strides = array<i32>} : memref<1x8x8x8xf32, #tpu.memory_space<vmem>>, vector<1x1x8x8xf32>,
    %c0_48 = arith.constant 0 : index
    %c5 = arith.constant 5 : index
    %c0_49 = arith.constant 0 : index
    %c0_50 = arith.constant 0 : index
    %42 = vector.load %arg1[%c0_48, %c5, %c0_49, %c0_50] : memref<1x8x16x16xbf16, #tpu.memory_space<vmem>>, vector<1x1x16x16xbf16>
    %43 = vector.shape_cast %42 : vector<1x1x16x16xbf16> to vector<16x16xbf16>
    %cst_51 = arith.constant dense<0.000000e+00> : vector<8x16xf32>
    %44 = tpu.matmul %0, %43, %cst_51 {dimension_numbers = #tpu.dot_dimension_numbers<[1], [0], [0], [1], [0, 0, 1, 1], [], []>} : vector<8x16xbf16>, vector<16x16xbf16>, vector<8x16xf32> -> vector<8x16xf32>
    %45 = arith.truncf %44 : vector<8x16xf32> to vector<8x16xbf16>
    %cst_52 = arith.constant dense<0.000000e+00> : vector<8x8xf32>
    %46 = tpu.matmul %45, %1, %cst_52 {dimension_numbers = #tpu.dot_dimension_numbers<[1], [0], [0], [1], [0, 0, 1, 1], [], []>} : vector<8x16xbf16>, vector<16x8xbf16>, vector<8x8xf32> -> vector<8x8xf32>
    %c0_53 = arith.constant 0 : index
    %c5_54 = arith.constant 5 : index
    %c0_55 = arith.constant 0 : index
    %c0_56 = arith.constant 0 : index
    %47 = vector.load %arg4[%c0_53, %c5_54, %c0_55, %c0_56] : memref<1x8x8x8xf32, #tpu.memory_space<vmem>>, vector<1x1x8x8xf32>
    %48 = vector.shape_cast %47 : vector<1x1x8x8xf32> to vector<8x8xf32>
    %49 = vector.shape_cast %46 : vector<8x8xf32> to vector<1x1x8x8xf32>
    tpu.vector_store %arg4[%c0_53, %c5_54, %c0_55, %c0_56], %49 {strides = array<i32>} : memref<1x8x8x8xf32, #tpu.memory_space<vmem>>, vector<1x1x8x8xf32>,
    %c0_57 = arith.constant 0 : index
    %c6 = arith.constant 6 : index
    %c0_58 = arith.constant 0 : index
    %c0_59 = arith.constant 0 : index
    %50 = vector.load %arg1[%c0_57, %c6, %c0_58, %c0_59] : memref<1x8x16x16xbf16, #tpu.memory_space<vmem>>, vector<1x1x16x16xbf16>
    %51 = vector.shape_cast %50 : vector<1x1x16x16xbf16> to vector<16x16xbf16>
    %cst_60 = arith.constant dense<0.000000e+00> : vector<8x16xf32>
    %52 = tpu.matmul %0, %51, %cst_60 {dimension_numbers = #tpu.dot_dimension_numbers<[1], [0], [0], [1], [0, 0, 1, 1], [], []>} : vector<8x16xbf16>, vector<16x16xbf16>, vector<8x16xf32> -> vector<8x16xf32>
    %53 = arith.truncf %52 : vector<8x16xf32> to vector<8x16xbf16>
    %cst_61 = arith.constant dense<0.000000e+00> : vector<8x8xf32>
    %54 = tpu.matmul %53, %1, %cst_61 {dimension_numbers = #tpu.dot_dimension_numbers<[1], [0], [0], [1], [0, 0, 1, 1], [], []>} : vector<8x16xbf16>, vector<16x8xbf16>, vector<8x8xf32> -> vector<8x8xf32>
    %c0_62 = arith.constant 0 : index
    %c6_63 = arith.constant 6 : index
    %c0_64 = arith.constant 0 : index
    %c0_65 = arith.constant 0 : index
    %55 = vector.load %arg4[%c0_62, %c6_63, %c0_64, %c0_65] : memref<1x8x8x8xf32, #tpu.memory_space<vmem>>, vector<1x1x8x8xf32>
    %56 = vector.shape_cast %55 : vector<1x1x8x8xf32> to vector<8x8xf32>
    %57 = vector.shape_cast %54 : vector<8x8xf32> to vector<1x1x8x8xf32>
    tpu.vector_store %arg4[%c0_62, %c6_63, %c0_64, %c0_65], %57 {strides = array<i32>} : memref<1x8x8x8xf32, #tpu.memory_space<vmem>>, vector<1x1x8x8xf32>,
    %c0_66 = arith.constant 0 : index
    %c7 = arith.constant 7 : index
    %c0_67 = arith.constant 0 : index
    %c0_68 = arith.constant 0 : index
    %58 = vector.load %arg1[%c0_66, %c7, %c0_67, %c0_68] : memref<1x8x16x16xbf16, #tpu.memory_space<vmem>>, vector<1x1x16x16xbf16>
    %59 = vector.shape_cast %58 : vector<1x1x16x16xbf16> to vector<16x16xbf16>
    %cst_69 = arith.constant dense<0.000000e+00> : vector<8x16xf32>
    %60 = tpu.matmul %0, %59, %cst_69 {dimension_numbers = #tpu.dot_dimension_numbers<[1], [0], [0], [1], [0, 0, 1, 1], [], []>} : vector<8x16xbf16>, vector<16x16xbf16>, vector<8x16xf32> -> vector<8x16xf32>
    %61 = arith.truncf %60 : vector<8x16xf32> to vector<8x16xbf16>
    %cst_70 = arith.constant dense<0.000000e+00> : vector<8x8xf32>
    %62 = tpu.matmul %61, %1, %cst_70 {dimension_numbers = #tpu.dot_dimension_numbers<[1], [0], [0], [1], [0, 0, 1, 1], [], []>} : vector<8x16xbf16>, vector<16x8xbf16>, vector<8x8xf32> -> vector<8x8xf32>
    %c0_71 = arith.constant 0 : index
    %c7_72 = arith.constant 7 : index
    %c0_73 = arith.constant 0 : index
    %c0_74 = arith.constant 0 : index
    %63 = vector.load %arg4[%c0_71, %c7_72, %c0_73, %c0_74] : memref<1x8x8x8xf32, #tpu.memory_space<vmem>>, vector<1x1x8x8xf32>
    %64 = vector.shape_cast %63 : vector<1x1x8x8xf32> to vector<8x8xf32>
    %65 = vector.shape_cast %62 : vector<8x8xf32> to vector<1x1x8x8xf32>
    tpu.vector_store %arg4[%c0_71, %c7_72, %c0_73, %c0_74], %65 {strides = array<i32>} : memref<1x8x8x8xf32, #tpu.memory_space<vmem>>, vector<1x1x8x8xf32>,
    return
  }
  func.func @transform_0(%arg0: i32) -> (i32, i32, i32, i32) {
    %c0_i32 = arith.constant 0 : i32
    %c0_i32_0 = arith.constant 0 : i32
    %c0_i32_1 = arith.constant 0 : i32
    %c0_i32_2 = arith.constant 0 : i32
    return %arg0, %c0_i32, %c0_i32_0, %c0_i32_1 : i32, i32, i32, i32
  }
  func.func @transform_1(%arg0: i32) -> (i32, i32) {
    %c0_i32 = arith.constant 0 : i32
    %c0_i32_0 = arith.constant 0 : i32
    %c0_i32_1 = arith.constant 0 : i32
    return %c0_i32, %c0_i32_0 : i32, i32
  }
  func.func @transform_2(%arg0: i32) -> (i32, i32) {
    %c0_i32 = arith.constant 0 : i32
    %c0_i32_0 = arith.constant 0 : i32
    %c0_i32_1 = arith.constant 0 : i32
    return %c0_i32, %c0_i32_0 : i32, i32
  }
  func.func @transform_3(%arg0: i32) -> (i32, i32, i32, i32) {
    %c0_i32 = arith.constant 0 : i32
    %c0_i32_0 = arith.constant 0 : i32
    %c0_i32_1 = arith.constant 0 : i32
    %c0_i32_2 = arith.constant 0 : i32
    return %arg0, %c0_i32, %c0_i32_0, %c0_i32_1 : i32, i32, i32, i32
  }
}

</mosaic_0001>

<bundles_post_ra>
// kernel: fn.1
= control target key start
LH: loop header
LB: loop body
LE: loop exit
PB: predicated region body
PF: predicated region fallthrough
CT: control target
= control target key end

     0   :  { %vm27_vm0 = vcmask 130048   ;;  %s558_s0 = inlined_call_operand.vmem [shape: bf16[1,8,16,16], index: 0, kind: input, shape index: {}]   ;;  %s559_s1 = inlined_call_operand.vmem [shape: bf16[8,16], index: 1, kind: input, shape index: {}]   ;;  %s560_s2 = inlined_call_operand.vmem [shape: bf16[16,8], index: 2, kind: input, shape index: {}]   ;;  %s561_s3 = inlined_call_operand.hbm [shape: f32[1,8,8,8], index: 3, kind: output, shape index: {}]  }
   0x1   :  { %v442_v0 = vld [vmem:[%s558_s0 + $0x8] sm:$0xff]  ;;  %v444_v1 = vld [vmem:[%s558_s0 + $0x18] sm:$0xff]  ;;  %v441_v2 = vld [vmem:[%s558_s0] sm:$0xff] }
   0x2   :  { %v443_v3 = vld [vmem:[%s558_s0 + $0x10] sm:$0xff]  ;;  %85 = vmatpush.bf16.msra.mxu2 %v442_v0  ;;  %v16_v4 = vld [vmem:[%s559_s1] sm:$0xf]  ;;  %v446_v5 = vld [vmem:[%s558_s0 + $0x28] sm:$0xff] }
   0x3   :  { %8 = vsyncpa [#allocation3], 0  ;;  %38 = vmatpush.bf16.msra.mxu0 %v441_v2  ;;  %v445_v6 = vld [vmem:[%s558_s0 + $0x20] sm:$0xff]  ;;  %v448_v7 = vld [vmem:[%s558_s0 + $0x38] sm:$0xff]  ;;  %vm67_vm1 = vcmask 64512   ;;  %s362_s6 = sshll.u32 %s561_s3, 4  ;;  %s363_s6 = int_to_ptr.hbm [resolvable:$true] %s362_s6 }
   0x4   :  { %v447_v8 = vld [vmem:[%s558_s0 + $0x30] sm:$0xff]  ;;  %v440_v9 = vld [vmem:[%s560_s2] sm:$0xff]  ;;  %s478_s0 = smov [#allocation2]   ;;  %s479_s7 = smov 128  }
   0x5   :  { %390 = vmatmul.msk.bf16.vlgmr.msra.gmra.mxu2 %vm27_vm0, %v16_v4  ;;  %61 = vmatpush.bf16.msra.mxu1 %v440_v9  ;;  %s360_s2 = sshll.u32 %s478_s0, 4  ;;  %s480_s8 = smov 8   ;;  %s361_s2 = int_to_ptr.vmem [resolvable:$true] %s360_s2 }
   0x6   :  { %167 = vmatpush.bf16.msrb.mxu2 %v444_v1  ;;  %378 = vmatmul.msk.bf16.vlgmr.msra.gmra.mxu0 %vm27_vm0, %v16_v4 }
   0x7   :  { %126 = vmatpush.bf16.msrb.mxu0 %v443_v3  ;;  %102 = vmatpush.bf16.msra.mxu3 %v440_v9 }
   0x9   :  { %143 = vmatpush.bf16.msrb.mxu1 %v440_v9 }
   0xa   :  { %249 = vmatpush.bf16.msra.mxu2 %v446_v5 }
   0xb   :  { %208 = vmatpush.bf16.msra.mxu0 %v445_v6  ;;  %184 = vmatpush.bf16.msrb.mxu3 %v440_v9 }
  0x15   :  { %406 = vmatmul.msk.bf16.vlgmr.msrb.gmra.mxu2 %vm27_vm0, %v16_v4 }
  0x16   :  { %398 = vmatmul.msk.bf16.vlgmr.msrb.gmra.mxu0 %vm27_vm0, %v16_v4  ;;  %331 = vmatpush.bf16.msrb.mxu2 %v448_v7 }
  0x17   :  { %290 = vmatpush.bf16.msrb.mxu0 %v447_v8 }
  0x25   :  { %422 = vmatmul.msk.bf16.vlgmr.msra.gmra.mxu2 %vm27_vm0, %v16_v4 }
  0x26   :  { %414 = vmatmul.msk.bf16.vlgmr.msra.gmra.mxu0 %vm27_vm0, %v16_v4 }
  0x35   :  { %438 = vmatmul.msk.bf16.vlgmr.msrb.gmra.mxu2 %vm27_vm0, %v16_v4 }
  0x36   :  { %430 = vmatmul.msk.bf16.vlgmr.msrb.gmra.mxu0 %vm27_vm0, %v16_v4 }
  0x83   :  { %v40_v10 = vpop.f32.mrf.mxu0 }
  0x84   :  { %v44_v11 = vpack.c.bf16 %v40_v10, %v40_v10 }
  0x86   :  { %383 = vmatmul.msk.bf16.vlgmr.msra.gmra.mxu1 %vm27_vm0, %v44_v11 }
  0x87   :  { %225 = vmatpush.bf16.msra.mxu1 %v440_v9 }
  0x88   :  { %v87_v12 = vpop.f32.mrf.mxu2 }
  0x89   :  { %v91_v13 = vpack.c.bf16 %v87_v12, %v87_v12 }
  0x8b   :  { %391 = vmatmul.msk.bf16.vlgmr.msra.gmra.mxu3 %vm27_vm0, %v91_v13  ;;  %v42_v14 = vpop.f32.mrf.mxu0 }
  0x8c   :  { %266 = vmatpush.bf16.msra.mxu3 %v440_v9 }
  0x90   :  { %v89_v15 = vpop.f32.mrf.mxu2 }
  0x93   :  { %v128_v16 = vpop.f32.mrf.mxu0 }
  0x94   :  { %v132_v17 = vpack.c.bf16 %v128_v16, %v128_v16 }
  0x96   :  { %399 = vmatmul.msk.bf16.vlgmr.msrb.gmra.mxu1 %vm27_vm0, %v132_v17 }
  0x97   :  { %307 = vmatpush.bf16.msrb.mxu1 %v440_v9 }
  0x98   :  { %v169_v18 = vpop.f32.mrf.mxu2 }
  0x99   :  { %v173_v19 = vpack.c.bf16 %v169_v18, %v169_v18 }
  0x9b   :  { %407 = vmatmul.msk.bf16.vlgmr.msrb.gmra.mxu3 %vm27_vm0, %v173_v19  ;;  %v130_v20 = vpop.f32.mrf.mxu0 }
  0x9c   :  { %348 = vmatpush.bf16.msrb.mxu3 %v440_v9 }
  0xa0   :  { %v171_v21 = vpop.f32.mrf.mxu2 }
  0xa3   :  { %v210_v22 = vpop.f32.mrf.mxu0 }
  0xa4   :  { %v214_v23 = vpack.c.bf16 %v210_v22, %v210_v22 }
  0xa6   :  { %415 = vmatmul.msk.bf16.vlgmr.msra.gmra.mxu1 %vm27_vm0, %v214_v23 }
  0xa8   :  { %v251_v24 = vpop.f32.mrf.mxu2 }
  0xa9   :  { %v255_v25 = vpack.c.bf16 %v251_v24, %v251_v24 }
  0xab   :  { %423 = vmatmul.msk.bf16.vlgmr.msra.gmra.mxu3 %vm27_vm0, %v255_v25  ;;  %v212_v26 = vpop.f32.mrf.mxu0 }
  0xb0   :  { %v253_v27 = vpop.f32.mrf.mxu2 }
  0xb3   :  { %v292_v28 = vpop.f32.mrf.mxu0 }
  0xb4   :  { %v296_v29 = vpack.c.bf16 %v292_v28, %v292_v28 }
  0xb6   :  { %431 = vmatmul.msk.bf16.vlgmr.msrb.gmra.mxu1 %vm27_vm0, %v296_v29 }
  0xb8   :  { %v333_v30 = vpop.f32.mrf.mxu2 }
  0xb9   :  { %v337_v31 = vpack.c.bf16 %v333_v30, %v333_v30 }
  0xbb   :  { %439 = vmatmul.msk.bf16.vlgmr.msrb.gmra.mxu3 %vm27_vm0, %v337_v31  ;;  %v294_v32 = vpop.f32.mrf.mxu0 }
  0xc0   :  { %v335_v33 = vpop.f32.mrf.mxu2 }
 0x103   :  { %v63_v34 = vpop.f32.mrf.mxu1 }
 0x104   :  { %68 = vst.msk [vmem:[#allocation2] sm:$0xff] %vm67_vm1, %v63_v34 }
 0x10b   :  { %v65_v35 = vpop.f32.mrf.mxu1 }
 0x10e   :  { %v104_v36 = vpop.f32.mrf.mxu3 }
 0x10f   :  { %109 = vst.msk [vmem:[#allocation2 + $0x8] sm:$0xff] %vm67_vm1, %v104_v36 }
 0x113   :  { %v145_v37 = vpop.f32.mrf.mxu1 }
 0x114   :  { %150 = vst.msk [vmem:[#allocation2 + $0x10] sm:$0xff] %vm67_vm1, %v145_v37 }
 0x116   :  { %v106_v38 = vpop.f32.mrf.mxu3 }
 0x11b   :  { %v147_v39 = vpop.f32.mrf.mxu1 }
 0x11e   :  { %v186_v40 = vpop.f32.mrf.mxu3 }
 0x11f   :  { %191 = vst.msk [vmem:[#allocation2 + $0x18] sm:$0xff] %vm67_vm1, %v186_v40 }
 0x123   :  { %v227_v41 = vpop.f32.mrf.mxu1 }
 0x124   :  { %232 = vst.msk [vmem:[#allocation2 + $0x20] sm:$0xff] %vm67_vm1, %v227_v41 }
 0x126   :  { %v188_v42 = vpop.f32.mrf.mxu3 }
 0x12b   :  { %v229_v43 = vpop.f32.mrf.mxu1 }
 0x12e   :  { %v268_v44 = vpop.f32.mrf.mxu3 }
 0x12f   :  { %273 = vst.msk [vmem:[#allocation2 + $0x28] sm:$0xff] %vm67_vm1, %v268_v44 }
 0x133   :  { %v309_v45 = vpop.f32.mrf.mxu1 }
 0x134   :  { %314 = vst.msk [vmem:[#allocation2 + $0x30] sm:$0xff] %vm67_vm1, %v309_v45 }
 0x136   :  { %v270_v46 = vpop.f32.mrf.mxu3 }
 0x13b   :  { %v311_v47 = vpop.f32.mrf.mxu1 }
 0x13e   :  { %v350_v48 = vpop.f32.mrf.mxu3 }
 0x13f   :  { %355 = vst.msk [vmem:[#allocation2 + $0x38] sm:$0xff] %vm67_vm1, %v350_v48 }
 0x140   :  { %368 = dma.vmem_to_hbm [thread:$0]  %s361_s2, 1024, %s363_s6, [#allocation3], %s479_s7, %s479_s7, %s480_s8  }
 0x146   :  { %v352_v49 = vpop.f32.mrf.mxu3 }
 0x147   :  { %476 = dma.done.wait [#allocation3], 1024  }
 0x148   :  { %477 = vsyncadd [#allocation3], 4294966272 }
 0x149   :  { %373 = vsyncpa [#allocation3], 1 }

</bundles_post_ra>
